<compile_context>
chip_gen: v5e
topology: v5e:2x2
jax: 0.10.0
libtpu: 0.0.40
codegen_flags: <defaults>
</compile_context>

<pallas_src>
import jax
import jax.numpy as jnp
from jax.experimental import pallas as pl
from jax.experimental.pallas import tpu as pltpu

_HAS_BUFFERED = hasattr(pl, "Buffered")   # feature-detect once at import
_CONST_BUFS = 1 if _HAS_BUFFERED else 2   # buffering of grid-invariant operands


def _round_up(n, m):
    return ((n + m - 1) // m) * m


def _pad_axis(a, target, axis):
    pad = target - a.shape[axis]
    if pad <= 0:
        return a
    widths = [(0, 0)] * a.ndim
    widths[axis] = (0, pad)
    return jnp.pad(a, widths)


def _tpu_hw():
    """(physical VMEM bytes per core, TensorCores per chip); safe defaults if unknown."""
    vmem = 128 << 20
    cores = 1
    try:
        info = pltpu.get_tpu_info()
        vmem = int(getattr(info, "vmem_capacity_bytes", vmem) or vmem)
        for name in ("num_cores", "core_count", "num_tensorcores",
                     "tensorcores_per_chip"):
            val = getattr(info, name, None)
            if val:
                cores = int(val)
                break
        else:
            # v7x is the only generation with 64 MiB VMEM per TC; it has 2 TCs/chip.
            cores = 2 if vmem <= (64 << 20) else 1
    except Exception:  # hw query unavailable (interpret mode / AOT on CPU) -> defaults
        pass
    return vmem, cores


# --------------------- kernel A: weights fully resident in VMEM ----------------------
def _mlp_resident_kernel(x_ref, w1_ref, b1_ref, w2_ref, b2_ref, o_ref):
    # fc1 + ReLU: MXU matmul with f32 accumulation; bias/ReLU epilogue stays in f32.
    h = jnp.dot(x_ref[...], w1_ref[...], preferred_element_type=jnp.float32)
    h = jnp.maximum(h + b1_ref[...], 0.0)
    # fc2: cast back to the weight dtype only at the MXU input.
    y = jnp.dot(h.astype(w2_ref.dtype), w2_ref[...],
                preferred_element_type=jnp.float32)
    o_ref[...] = (y + b2_ref[...]).astype(o_ref.dtype)


# --------------- kernel B: hidden dim tiled (reduction axis for fc2) -----------------
def _mlp_hidden_tiled_kernel(x_ref, w1_ref, b1_ref, w2_ref, b2_ref, o_ref, acc_ref):
    hb = pl.program_id(1)

    @pl.when(hb == 0)
    def _():
        acc_ref[...] = jnp.zeros_like(acc_ref)

    # Hidden blocks are disjoint, so per-block fc1+ReLU followed by accumulating that
    # block's fc2 contribution is exact.
    h = jnp.dot(x_ref[...], w1_ref[...], preferred_element_type=jnp.float32)
    h = jnp.maximum(h + b1_ref[...], 0.0)
    acc_ref[...] += jnp.dot(h.astype(w2_ref.dtype), w2_ref[...],
                            preferred_element_type=jnp.float32)

    @pl.when(hb == pl.num_programs(1) - 1)
    def _():
        o_ref[...] = (acc_ref[...] + b2_ref[...]).astype(o_ref.dtype)


# ------------------------------ VMEM working-set models ------------------------------
def _resident_vmem(tm, in_ch, hid_p, out_p, wbytes, xbytes):
    weights = (in_ch * hid_p + hid_p * out_p) * wbytes + (hid_p + out_p) * 4
    return (weights * _CONST_BUFS
            + 2 * tm * in_ch * xbytes            # x double buffer
            + 2 * tm * out_p * xbytes            # out double buffer
            + tm * hid_p * 4 + tm * out_p * 4)   # f32 intermediates


def _tiled_vmem(tm, in_ch, block_h, out_p, wbytes, xbytes, wbuf):
    return ((in_ch * block_h + block_h * out_p) * wbytes * wbuf   # streamed W1/W2
            + block_h * 4 * wbuf + out_p * 4 * _CONST_BUFS        # b1 slice / b2
            + 2 * tm * in_ch * xbytes
            + 2 * tm * out_p * xbytes
            + tm * out_p * 4                                      # f32 acc scratch
            + tm * block_h * 4 + tm * out_p * 4)                  # f32 intermediates


def make_mlp(w1, b1, w2, b2, *, tm=256, block_h=None, weight_buffers=None,
             mxu_dtype=None):
    """Builds apply(x) computing fc2(relu(fc1(x))).

    w1: (in_ch, hidden)  (pre-transposed vs PyTorch nn.Linear), b1: (hidden,),
    w2: (hidden, out_ch), b2: (out_ch,).  Weights are padded/cast ONCE here.
    `mxu_dtype=jnp.bfloat16` casts MXU operands to bf16 (accumulation stays f32).
    """
    in_ch, hidden = w1.shape
    out_ch = w2.shape[1]
    assert b1.shape == (hidden,) and w2.shape[0] == hidden and b2.shape == (out_ch,)

    vmem_cap, num_tc = _tpu_hw()
    # Usable scoped-VMEM budget: physical capacity minus compiler-internal headroom
    # (~52 MiB usable on v7x, ~116 MiB on v5e/v6e).
    vmem_usable = max(vmem_cap - (12 << 20), 24 << 20)

    wdt = jnp.dtype(w1.dtype) if mxu_dtype is None else jnp.dtype(mxu_dtype)
    witem = wdt.itemsize
    xitem = 4  # conservative (f32 activations) for the residency decision

    hid128 = _round_up(hidden, 128)
    out_p = _round_up(out_ch, 128)
    # in_ch is NOT padded: the x/W1 blocks use the full (unpadded) contraction dim,
    # which is legal (block dim == full array dim) and keeps x HBM reads minimal.

    # -------- residency / hidden-tiling decision (full working set, gen-aware) -------
    if block_h is None:
        if _resident_vmem(tm, in_ch, hid128, out_p, witem, xitem) <= vmem_usable:
            block_h = hid128                      # weights stay VMEM-resident
        else:
            # Bias toward 256-deep blocks (v6e/v7x MXU depth); hidden is padded up to
            # a multiple of block_h rather than requiring block_h to divide it.
            block_h = 128
            for cand in list(range(_round_up(hid128, 256), 0, -256)) + [128]:
                if _tiled_vmem(tm, in_ch, cand, out_p, witem, xitem, 2) <= vmem_usable:
                    block_h = cand
                    break
    assert block_h % 128 == 0, "hidden block must be a multiple of 128 lanes"
    hid_p = _round_up(hid128, block_h)
    hid_steps = hid_p // block_h
    tiled = hid_steps > 1

    if tiled:
        if weight_buffers is None:
            # Deeper weight-stream buffering only when it pays off (>=3 hidden steps)
            # and VMEM headroom exists; otherwise default double buffering.
            weight_buffers = 3 if (hid_steps >= 3 and _tiled_vmem(
                tm, in_ch, block_h, out_p, witem, xitem, 3) <= vmem_usable) else 2
        wbuf = max(1, int(weight_buffers))
    else:
        wbuf = 2

    # -------- pad / cast weights once (hoisted out of the per-call path) --------
    w1_p = _pad_axis(w1.astype(wdt), hid_p, 1)                        # (in_ch, hid_p)
    b1_p = _pad_axis(b1.astype(jnp.float32).reshape(1, hidden), hid_p, 1)
    w2_p = _pad_axis(_pad_axis(w2.astype(wdt), hid_p, 0), out_p, 1)   # (hid_p, out_p)
    b2_p = _pad_axis(b2.astype(jnp.float32).reshape(1, out_ch), out_p, 1)

    const = dict(pipeline_mode=pl.Buffered(1)) if _HAS_BUFFERED else {}
    stream = (dict(pipeline_mode=pl.Buffered(wbuf))
              if (_HAS_BUFFERED and wbuf != 2) else {})

    def apply(x):
        lead = x.shape[:-1]
        assert x.shape[-1] == in_ch
        xc = x.reshape(-1, in_ch)
        if mxu_dtype is not None:
            xc = xc.astype(wdt)
        N = xc.shape[0]
        xbytes = jnp.dtype(xc.dtype).itemsize
        row_align = 16 if xbytes < 4 else 8       # bf16 packs 16 rows per sublane tile

        tm_eff = _round_up(min(tm, _round_up(N, row_align)), row_align)
        if num_tc > 1:
            # Keep an even number of batch steps so both v7x TensorCores get work.
            steps = -(-N // tm_eff)
            if steps % 2 == 1:
                half = _round_up((tm_eff + 1) // 2, row_align)
                if half >= min(64, tm_eff):
                    tm_eff = half
        n_p = _round_up(N, tm_eff)
        batch_steps = n_p // tm_eff
        x_p = _pad_axis(xc, n_p, 0)               # batch padding only (zeros, exact)

        # Advisory cost: real (unpadded) flops; the tiled path re-streams W1/W2 once
        # per batch tile.
        w_bytes = (w1_p.size + w2_p.size) * witem
        cost = pl.CostEstimate(
            flops=int(2 * N * (in_ch * hidden + hidden * out_ch)),
            transcendentals=0,
            bytes_accessed=int(N * in_ch * xbytes
                               + w_bytes * (batch_steps if tiled else 1)
                               + (b1_p.size + b2_p.size) * 4
                               + n_p * out_p * xbytes),
        )

        if not tiled:
            est = _resident_vmem(tm_eff, in_ch, hid_p, out_p, witem, xbytes)
            grid_spec = pltpu.PrefetchScalarGridSpec(
                num_scalar_prefetch=0,
                grid=(batch_steps,),
                in_specs=[
                    pl.BlockSpec((tm_eff, in_ch), lambda i: (i, 0)),           # x
                    pl.BlockSpec((in_ch, hid_p), lambda i: (0, 0), **const),   # W1
                    pl.BlockSpec((1, hid_p), lambda i: (0, 0), **const),       # b1
                    pl.BlockSpec((hid_p, out_p), lambda i: (0, 0), **const),   # W2
                    pl.BlockSpec((1, out_p), lambda i: (0, 0), **const),       # b2
                ],
                out_specs=pl.BlockSpec((tm_eff, out_p), lambda i: (i, 0)),
            )
            kernel = _mlp_resident_kernel
            semantics = ("parallel",)
        else:
            est = _tiled_vmem(tm_eff, in_ch, block_h, out_p, witem, xbytes, wbuf)
            grid_spec = pltpu.PrefetchScalarGridSpec(
                num_scalar_prefetch=0,
                grid=(batch_steps, hid_steps),     # hidden (reduction) axis last
                in_specs=[
                    pl.BlockSpec((tm_eff, in_ch), lambda i, h: (i, 0)),            # x
                    pl.BlockSpec((in_ch, block_h), lambda i, h: (0, h), **stream),  # W1
                    pl.BlockSpec((1, block_h), lambda i, h: (0, h), **stream),      # b1
                    pl.BlockSpec((block_h, out_p), lambda i, h: (h, 0), **stream),  # W2
                    pl.BlockSpec((1, out_p), lambda i, h: (0, 0), **const),         # b2
                ],
                out_specs=pl.BlockSpec((tm_eff, out_p), lambda i, h: (i, 0)),
                scratch_shapes=[pltpu.VMEM((tm_eff, out_p), jnp.float32)],
            )
            kernel = _mlp_hidden_tiled_kernel
            semantics = ("parallel", "arbitrary")

        # Scoped-VMEM limit: estimate + headroom, capped below physical VMEM.
        vmem_limit = int(min(max(est + (8 << 20), 24 << 20), vmem_usable))

        out_pad = pl.pallas_call(
            kernel,
            out_shape=jax.ShapeDtypeStruct((n_p, out_p), xc.dtype),
            grid_spec=grid_spec,
            compiler_params=pltpu.CompilerParams(
                dimension_semantics=semantics,
                vmem_limit_bytes=vmem_limit),
            cost_estimate=cost,
        )(x_p, w1_p, b1_p, w2_p, b2_p)

        return out_pad[:N, :out_ch].reshape(*lead, out_ch)

    return apply


if __name__ == "__main__":
    key = jax.random.PRNGKey(0)

    def ref_mlp(x, w1, b1, w2, b2):
        return jnp.maximum(x @ w1 + b1, 0.0) @ w2 + b2

    # --- Test 1: MLP(in=32, hidden=64, out=16); weights stay VMEM-resident.
    N, in_ch, hidden, out_ch = 128, 32, 64, 16
    kx, kw1, kb1, kw2, kb2, key = jax.random.split(key, 6)
    x = jax.random.normal(kx, (N, in_ch), dtype=jnp.float32)
    w1 = jax.random.normal(kw1, (in_ch, hidden), dtype=jnp.float32) * 0.1
    b1 = jax.random.normal(kb1, (hidden,), dtype=jnp.float32) * 0.1
    w2 = jax.random.normal(kw2, (hidden, out_ch), dtype=jnp.float32) * 0.1
    b2 = jax.random.normal(kb2, (out_ch,), dtype=jnp.float32) * 0.1

    mlp = make_mlp(w1, b1, w2, b2)
    out = jax.block_until_ready(mlp(x))
    ref = ref_mlp(x, w1, b1, w2, b2)
    assert out.shape == (N, out_ch)
    assert jnp.allclose(out, ref, atol=5e-3, rtol=5e-3), \
        float(jnp.max(jnp.abs(out - ref)))

    # --- Test 2: ragged shapes + forced hidden-dim reduction tiling (kernel B path).
    N2, in2, hid2, out2 = 96, 48, 256, 40
    kx, kw1, kb1, kw2, kb2, key = jax.random.split(key, 6)
    x2 = jax.random.normal(kx, (N2, in2), dtype=jnp.float32)
    w1b = jax.random.normal(kw1, (in2, hid2), dtype=jnp.float32) * 0.1
    b1b = jax.random.normal(kb1, (hid2,), dtype=jnp.float32) * 0.1
    w2b = jax.random.normal(kw2, (hid2, out2), dtype=jnp.float32) * 0.1
    b2b = jax.random.normal(kb2, (out2,), dtype=jnp.float32) * 0.1

    mlp2 = make_mlp(w1b, b1b, w2b, b2b, tm=64, block_h=128)
    out2_arr = jax.block_until_ready(mlp2(x2))
    ref2 = ref_mlp(x2, w1b, b1b, w2b, b2b)
    assert out2_arr.shape == (N2, out2)
    assert jnp.allclose(out2_arr, ref2, atol=5e-3, rtol=5e-3), \
        float(jnp.max(jnp.abs(out2_arr - ref2)))

    # --- Test 3: bf16 MXU operands (f32 accumulation), looser tolerance.
    mlp_bf16 = make_mlp(w1, b1, w2, b2, mxu_dtype=jnp.bfloat16)
    out3 = jax.block_until_ready(mlp_bf16(x))
    assert out3.shape == (N, out_ch)
    assert jnp.allclose(out3.astype(jnp.float32), ref, atol=1e-1, rtol=1e-1)

    print("KERNEL_OK")
</pallas_src>

<mosaic_0001>
module attributes {stable_mosaic.version = 11 : i64} {
  func.func @_mlp_resident_kernel(%arg0: i32, %arg1: memref<128x32xf32, #tpu.memory_space<vmem>>, %arg2: memref<32x128xf32, #tpu.memory_space<vmem>>, %arg3: memref<1x128xf32, #tpu.memory_space<vmem>>, %arg4: memref<128x128xf32, #tpu.memory_space<vmem>>, %arg5: memref<1x128xf32, #tpu.memory_space<vmem>>, %arg6: memref<128x128xf32, #tpu.memory_space<vmem>>) attributes {dimension_semantics = [#tpu.dimension_semantics<parallel>], iteration_bounds = array<i64: 1>, scalar_prefetch = 0 : i64, scratch_operands = 0 : i64, tpu.core_type = #tpu.core_type<tc>, window_params = [{transform_indices = @transform_0, window_bounds = array<i64: 128, 32>}, {pipeline_mode = #tpu.pipeline_mode<synchronous>, transform_indices = @transform_1, window_bounds = array<i64: 32, 128>}, {pipeline_mode = #tpu.pipeline_mode<synchronous>, transform_indices = @transform_2, window_bounds = array<i64: 1, 128>}, {pipeline_mode = #tpu.pipeline_mode<synchronous>, transform_indices = @transform_3, window_bounds = array<i64: 128, 128>}, {pipeline_mode = #tpu.pipeline_mode<synchronous>, transform_indices = @transform_4, window_bounds = array<i64: 1, 128>}, {transform_indices = @transform_5, window_bounds = array<i64: 128, 128>}]} {
    %c0 = arith.constant 0 : index
    %c0_0 = arith.constant 0 : index
    %0 = vector.load %arg1[%c0, %c0_0] : memref<128x32xf32, #tpu.memory_space<vmem>>, vector<128x32xf32>
    %c0_1 = arith.constant 0 : index
    %c0_2 = arith.constant 0 : index
    %1 = vector.load %arg2[%c0_1, %c0_2] : memref<32x128xf32, #tpu.memory_space<vmem>>, vector<32x128xf32>
    %cst = arith.constant dense<0.000000e+00> : vector<128x128xf32>
    %2 = tpu.matmul %0, %1, %cst {dimension_numbers = #tpu.dot_dimension_numbers<[1], [0], [0], [1], [0, 0, 1, 1], [], []>} : vector<128x32xf32>, vector<32x128xf32>, vector<128x128xf32> -> vector<128x128xf32>
    %c0_3 = arith.constant 0 : index
    %c0_4 = arith.constant 0 : index
    %3 = vector.load %arg3[%c0_3, %c0_4] : memref<1x128xf32, #tpu.memory_space<vmem>>, vector<1x128xf32>
    %4 = vector.broadcast %3 : vector<1x128xf32> to vector<128x128xf32>
    %5 = arith.addf %2, %4 : vector<128x128xf32>
    %cst_5 = arith.constant 0.000000e+00 : f32
    %6 = vector.broadcast %cst_5 : f32 to vector<128x128xf32>
    %7 = arith.maximumf %5, %6 : vector<128x128xf32>
    %c0_6 = arith.constant 0 : index
    %c0_7 = arith.constant 0 : index
    %8 = vector.load %arg4[%c0_6, %c0_7] : memref<128x128xf32, #tpu.memory_space<vmem>>, vector<128x128xf32>
    %cst_8 = arith.constant dense<0.000000e+00> : vector<128x128xf32>
    %9 = tpu.matmul %7, %8, %cst_8 {dimension_numbers = #tpu.dot_dimension_numbers<[1], [0], [0], [1], [0, 0, 1, 1], [], []>} : vector<128x128xf32>, vector<128x128xf32>, vector<128x128xf32> -> vector<128x128xf32>
    %c0_9 = arith.constant 0 : index
    %c0_10 = arith.constant 0 : index
    %10 = vector.load %arg5[%c0_9, %c0_10] : memref<1x128xf32, #tpu.memory_space<vmem>>, vector<1x128xf32>
    %11 = vector.broadcast %10 : vector<1x128xf32> to vector<128x128xf32>
    %12 = arith.addf %9, %11 : vector<128x128xf32>
    %c0_11 = arith.constant 0 : index
    %c0_12 = arith.constant 0 : index
    %13 = vector.load %arg6[%c0_11, %c0_12] : memref<128x128xf32, #tpu.memory_space<vmem>>, vector<128x128xf32>
    tpu.vector_store %arg6[%c0_11, %c0_12], %12 {strides = array<i32>} : memref<128x128xf32, #tpu.memory_space<vmem>>, vector<128x128xf32>,
    return
  }
  func.func @transform_0(%arg0: i32) -> (i32, i32) {
    %c0_i32 = arith.constant 0 : i32
    %c0_i32_0 = arith.constant 0 : i32
    return %arg0, %c0_i32 : i32, i32
  }
  func.func @transform_1(%arg0: i32) -> (i32, i32) {
    %c0_i32 = arith.constant 0 : i32
    %c0_i32_0 = arith.constant 0 : i32
    %c0_i32_1 = arith.constant 0 : i32
    return %c0_i32, %c0_i32_0 : i32, i32
  }
  func.func @transform_2(%arg0: i32) -> (i32, i32) {
    %c0_i32 = arith.constant 0 : i32
    %c0_i32_0 = arith.constant 0 : i32
    %c0_i32_1 = arith.constant 0 : i32
    return %c0_i32, %c0_i32_0 : i32, i32
  }
  func.func @transform_3(%arg0: i32) -> (i32, i32) {
    %c0_i32 = arith.constant 0 : i32
    %c0_i32_0 = arith.constant 0 : i32
    %c0_i32_1 = arith.constant 0 : i32
    return %c0_i32, %c0_i32_0 : i32, i32
  }
  func.func @transform_4(%arg0: i32) -> (i32, i32) {
    %c0_i32 = arith.constant 0 : i32
    %c0_i32_0 = arith.constant 0 : i32
    %c0_i32_1 = arith.constant 0 : i32
    return %c0_i32, %c0_i32_0 : i32, i32
  }
  func.func @transform_5(%arg0: i32) -> (i32, i32) {
    %c0_i32 = arith.constant 0 : i32
    %c0_i32_0 = arith.constant 0 : i32
    return %arg0, %c0_i32 : i32, i32
  }
}

</mosaic_0001>

<bundles_post_ra>
// kernel: tpu_custom_call.1
= control target key start
LH: loop header
LB: loop body
LE: loop exit
PB: predicated region body
PF: predicated region fallthrough
CT: control target
= control target key end

     0   :  { %s543_s0 = inlined_call_operand.vmem [shape: f32[128,32], index: 0, kind: input, shape index: {}]   ;;  %s544_s1 = inlined_call_operand.vmem [shape: f32[32,128], index: 1, kind: input, shape index: {}]   ;;  %s545_s2 = inlined_call_operand.vmem [shape: f32[1,128], index: 2, kind: input, shape index: {}]   ;;  %s546_s3 = inlined_call_operand.vmem [shape: f32[128,128], index: 3, kind: input, shape index: {}]   ;;  %s547_s4 = inlined_call_operand.vmem [shape: f32[1,128], index: 4, kind: input, shape index: {}]   ;;  %s548_s5 = inlined_call_operand.hbm [shape: f32[128,128], index: 5, kind: output, shape index: {}]  }
   0x1   :  { %v40_v0 = vld [vmem:[%s544_s1 + $0x18] sm:$0xff]  ;;  %v39_v1 = vld [vmem:[%s544_s1 + $0x10] sm:$0xff]  ;;  %v38_v2 = vld [vmem:[%s544_s1 + $0x8] sm:$0xff] }
   0x2   :  { %106 = vmatpush.msra.mxu0 %v40_v0  ;;  %310 = vmatpush.msra.mxu3 %v40_v0 }
   0x4   :  { %107 = vmatpush.msra.mxu0 %v39_v1  ;;  %311 = vmatpush.msra.mxu3 %v39_v1 }
   0x5   :  { %10 = vsyncpa [#allocation3], 0  ;;  %v37_v3 = vld [vmem:[%s544_s1] sm:$0xff]  ;;  %vm45_vm0 = vcmask 261120   ;;  %v22_v5 = vld [vmem:[%s543_s0 + $0x8] sm:$0xff]  ;;  %s282_s16 = sshll.u32 %s548_s5, 4  ;;  %s283_s16 = int_to_ptr.hbm [resolvable:$true] %s282_s16 }
   0x6   :  { %108 = vmatpush.msra.mxu0 %v38_v2  ;;  %v21_v4 = vld [vmem:[%s543_s0] sm:$0xff]  ;;  %312 = vmatpush.msra.mxu3 %v38_v2  ;;  %v23_v6 = vld [vmem:[%s543_s0 + $0x10] sm:$0xff]  ;;  %v24_v7 = vld [vmem:[%s543_s0 + $0x18] sm:$0xff]  ;;  %s378_s17 = smov 128   ;;  %s379_s18 = smov 8  }
   0x7   :  { %v31_v8 = vld [vmem:[%s543_s0 + $0x50] sm:$0xff]  ;;  %v25_v9 = vld [vmem:[%s543_s0 + $0x20] sm:$0xff]  ;;  %v32_v10 = vld [vmem:[%s543_s0 + $0x58] sm:$0xff] }
   0x8   :  { %109 = vmatpush.msra.mxu0 %v37_v3  ;;  %313 = vmatpush.msra.mxu3 %v37_v3  ;;  %v26_v11 = vld [vmem:[%s543_s0 + $0x28] sm:$0xff]  ;;  %v33_v12 = vld [vmem:[%s543_s0 + $0x60] sm:$0xff]  ;;  %v190_v13 = vld [vmem:[%s546_s3 + $0x78] sm:$0xff] }
   0x9   :  { %294 = vmatmul.msk.f32.vlgmr.msra.gmra.mxu0 %vm45_vm0, %v21_v4  ;;  %304 = vmatmul.msk.f32.vlgmr.msra.gmra.mxu3 %vm45_vm0, %v31_v8  ;;  %v189_v14 = vld [vmem:[%s546_s3 + $0x70] sm:$0xff]  ;;  %v188_v15 = vld [vmem:[%s546_s3 + $0x68] sm:$0xff]  ;;  %v187_v17 = vld [vmem:[%s546_s3 + $0x60] sm:$0xff] }
   0xa   :  { %195 = vmatpush.msra.mxu1 %v190_v13  ;;  %314 = vmatpush.msra.mxu2 %v190_v13  ;;  %v27_v16 = vld [vmem:[%s543_s0 + $0x30] sm:$0xff]  ;;  %v34_v18 = vld [vmem:[%s543_s0 + $0x68] sm:$0xff]  ;;  %v186_v19 = vld [vmem:[%s546_s3 + $0x58] sm:$0xff] }
   0xb   :  { %315 = vmatpush.msrb.mxu3 %v190_v13  ;;  %v185_v20 = vld [vmem:[%s546_s3 + $0x50] sm:$0xff]  ;;  %v184_v21 = vld [vmem:[%s546_s3 + $0x48] sm:$0xff]  ;;  %v28_v22 = vld [vmem:[%s543_s0 + $0x38] sm:$0xff] }
   0xc   :  { %196 = vmatpush.msra.mxu1 %v189_v14  ;;  %316 = vmatpush.msra.mxu2 %v189_v14  ;;  %v183_v23 = vld [vmem:[%s546_s3 + $0x40] sm:$0xff]  ;;  %v35_v24 = vld [vmem:[%s543_s0 + $0x70] sm:$0xff]  ;;  %v182_v25 = vld [vmem:[%s546_s3 + $0x38] sm:$0xff] }
   0xd   :  { %317 = vmatpush.msrb.mxu3 %v189_v14  ;;  %v181_v26 = vld [vmem:[%s546_s3 + $0x30] sm:$0xff]  ;;  %v180_v27 = vld [vmem:[%s546_s3 + $0x28] sm:$0xff]  ;;  %v29_v28 = vld [vmem:[%s543_s0 + $0x40] sm:$0xff] }
   0xe   :  { %197 = vmatpush.msra.mxu1 %v188_v15  ;;  %318 = vmatpush.msra.mxu2 %v188_v15  ;;  %v179_v29 = vld [vmem:[%s546_s3 + $0x20] sm:$0xff]  ;;  %v36_v30 = vld [vmem:[%s543_s0 + $0x78] sm:$0xff]  ;;  %v30_v32 = vld [vmem:[%s543_s0 + $0x48] sm:$0xff] }
   0xf   :  { %319 = vmatpush.msrb.mxu3 %v188_v15  ;;  %v178_v31 = vld [vmem:[%s546_s3 + $0x18] sm:$0xff]  ;;  %v177_v33 = vld [vmem:[%s546_s3 + $0x10] sm:$0xff]  ;;  %v176_v34 = vld [vmem:[%s546_s3 + $0x8] sm:$0xff] }
  0x10   :  { %198 = vmatpush.msra.mxu1 %v187_v17  ;;  %320 = vmatpush.msra.mxu2 %v187_v17  ;;  %v175_v35 = vld [vmem:[%s546_s3] sm:$0xff] }
  0x11   :  { %295 = vmatmul.msk.f32.gmra.mxu0 %vm45_vm0, %v22_v5  ;;  %305 = vmatmul.msk.f32.gmra.mxu3 %vm45_vm0, %v32_v10  ;;  %v349_v36 = vld [vmem:[%s545_s2] ss:$0 sm:$0xff] }
  0x12   :  { %199 = vmatpush.msra.mxu1 %v186_v19  ;;  %321 = vmatpush.msrb.mxu3 %v187_v17 }
  0x13   :  { %322 = vmatpush.msra.mxu2 %v186_v19 }
  0x14   :  { %200 = vmatpush.msra.mxu1 %v185_v20  ;;  %323 = vmatpush.msrb.mxu3 %v186_v19 }
  0x15   :  { %324 = vmatpush.msra.mxu2 %v185_v20 }
  0x16   :  { %201 = vmatpush.msra.mxu1 %v184_v21  ;;  %325 = vmatpush.msrb.mxu3 %v185_v20 }
  0x17   :  { %326 = vmatpush.msra.mxu2 %v184_v21 }
  0x18   :  { %202 = vmatpush.msra.mxu1 %v183_v23  ;;  %327 = vmatpush.msrb.mxu3 %v184_v21  ;;  %v350_v21 = vld [vmem:[%s547_s4] ss:$0 sm:$0xff]  ;;  %s377_s4 = smov [#allocation2]  }
  0x19   :  { %296 = vmatmul.msk.f32.gmra.mxu0 %vm45_vm0, %v23_v6  ;;  %306 = vmatmul.msk.f32.gmra.mxu3 %vm45_vm0, %v33_v12  ;;  %s280_s13 = sshll.u32 %s377_s4, 4  ;;  %s281_s13 = int_to_ptr.vmem [resolvable:$true] %s280_s13 }
  0x1a   :  { %328 = vmatpush.msra.mxu2 %v183_v23  ;;  %203 = vmatpush.msra.mxu1 %v182_v25 }
  0x1b   :  { %329 = vmatpush.msrb.mxu3 %v183_v23 }
  0x1c   :  { %330 = vmatpush.msra.mxu2 %v182_v25  ;;  %204 = vmatpush.msra.mxu1 %v181_v26 }
  0x1d   :  { %331 = vmatpush.msrb.mxu3 %v182_v25 }
  0x1e   :  { %332 = vmatpush.msra.mxu2 %v181_v26  ;;  %205 = vmatpush.msra.mxu1 %v180_v27 }
  0x1f   :  { %333 = vmatpush.msrb.mxu3 %v181_v26 }
  0x20   :  { %334 = vmatpush.msra.mxu2 %v180_v27  ;;  %206 = vmatpush.msra.mxu1 %v179_v29 }
  0x21   :  { %297 = vmatmul.msk.f32.gmra.mxu0 %vm45_vm0, %v24_v7  ;;  %307 = vmatmul.msk.f32.gmra.mxu3 %vm45_vm0, %v34_v18 }
  0x22   :  { %336 = vmatpush.msra.mxu2 %v179_v29  ;;  %207 = vmatpush.msra.mxu1 %v178_v31 }
  0x23   :  { %335 = vmatpush.msrb.mxu3 %v180_v27 }
  0x24   :  { %338 = vmatpush.msra.mxu2 %v178_v31  ;;  %208 = vmatpush.msra.mxu1 %v177_v33 }
  0x25   :  { %337 = vmatpush.msrb.mxu3 %v179_v29 }
  0x26   :  { %340 = vmatpush.msra.mxu2 %v177_v33  ;;  %209 = vmatpush.msra.mxu1 %v176_v34 }
  0x27   :  { %339 = vmatpush.msrb.mxu3 %v178_v31 }
  0x28   :  { %342 = vmatpush.msra.mxu2 %v176_v34  ;;  %210 = vmatpush.msra.mxu1 %v175_v35 }
  0x29   :  { %298 = vmatmul.msk.f32.gmra.mxu0 %vm45_vm0, %v25_v9  ;;  %308 = vmatmul.msk.f32.gmra.mxu3 %vm45_vm0, %v35_v24 }
  0x2a   :  { %341 = vmatpush.msrb.mxu3 %v177_v33  ;;  %344 = vmatpush.msra.mxu2 %v175_v35 }
  0x2c   :  { %343 = vmatpush.msrb.mxu3 %v176_v34 }
  0x2e   :  { %345 = vmatpush.msrb.mxu3 %v175_v35 }
  0x31   :  { %299 = vmatmul.msk.f32.gmra.mxu0 %vm45_vm0, %v26_v11  ;;  %309 = vmatmul.msk.f32.gmra.mxu3 %vm45_vm0, %v36_v30 }
  0x39   :  { %300 = vmatmul.msk.f32.gmra.mxu0 %vm45_vm0, %v27_v16 }
  0x41   :  { %301 = vmatmul.msk.f32.gmra.mxu0 %vm45_vm0, %v28_v22 }
  0x49   :  { %302 = vmatmul.msk.f32.gmra.mxu0 %vm45_vm0, %v29_v28 }
  0x51   :  { %303 = vmatmul.msk.f32.gmra.mxu0 %vm45_vm0, %v30_v32 }
  0x86   :  { %v111_v37 = vpop.f32.mrf.mxu0 }
  0x87   :  { %v112_v38 = vadd.f32 %v349_v36, %v111_v37 }
  0x89   :  { %v159_v39 = vmax.f32 %v112_v38, 0.0 }
  0x8b   :  { %211 = vmatmul.f32.vlgmr.msra.gmra.mxu1 %v159_v39 }
  0x8c   :  { %v141_v50 = vpop.f32.mrf.mxu3 }
  0x8d   :  { %v142_v13 = vadd.f32 %v349_v36, %v141_v50 }
  0x8e   :  { %v114_v40 = vpop.f32.mrf.mxu0 }
  0x8f   :  { %v115_v41 = vadd.f32 %v349_v36, %v114_v40  ;;  %v169_v14 = vmax.f32 %v142_v13, 0.0 }
  0x91   :  { %v160_v42 = vmax.f32 %v115_v41, 0.0 }
  0x93   :  { %214 = vmatmul.f32.gmra.mxu1 %v160_v42 }
  0x94   :  { %v144_v54 = vpop.f32.mrf.mxu3 }
  0x95   :  { %v145_v15 = vadd.f32 %v349_v36, %v144_v54 }
  0x96   :  { %v117_v43 = vpop.f32.mrf.mxu0 }
  0x97   :  { %v118_v44 = vadd.f32 %v349_v36, %v117_v43  ;;  %v170_v16 = vmax.f32 %v145_v15, 0.0 }
  0x99   :  { %v161_v45 = vmax.f32 %v118_v44, 0.0 }
  0x9b   :  { %217 = vmatmul.f32.gmra.mxu1 %v161_v45 }
  0x9c   :  { %v147_v58 = vpop.f32.mrf.mxu3 }
  0x9d   :  { %v148_v17 = vadd.f32 %v349_v36, %v147_v58 }
  0x9e   :  { %v120_v46 = vpop.f32.mrf.mxu0 }
  0x9f   :  { %v121_v47 = vadd.f32 %v349_v36, %v120_v46  ;;  %v171_v18 = vmax.f32 %v148_v17, 0.0 }
  0xa1   :  { %v162_v48 = vmax.f32 %v121_v47, 0.0 }
  0xa3   :  { %220 = vmatmul.f32.gmra.mxu1 %v162_v48 }
  0xa4   :  { %v150_v62 = vpop.f32.mrf.mxu3 }
  0xa5   :  { %v151_v19 = vadd.f32 %v349_v36, %v150_v62 }
  0xa6   :  { %v123_v49 = vpop.f32.mrf.mxu0 }
  0xa7   :  { %v124_v51 = vadd.f32 %v349_v36, %v123_v49  ;;  %v172_v20 = vmax.f32 %v151_v19, 0.0 }
  0xa9   :  { %v163_v52 = vmax.f32 %v124_v51, 0.0 }
  0xab   :  { %223 = vmatmul.f32.gmra.mxu1 %v163_v52 }
  0xac   :  { %v153_v2 = vpop.f32.mrf.mxu3 }
  0xad   :  { %v154_v4 = vadd.f32 %v349_v36, %v153_v2 }
  0xae   :  { %v126_v53 = vpop.f32.mrf.mxu0 }
  0xaf   :  { %v127_v55 = vadd.f32 %v349_v36, %v126_v53  ;;  %v173_v6 = vmax.f32 %v154_v4, 0.0 }
  0xb1   :  { %v164_v56 = vmax.f32 %v127_v55, 0.0  ;;  %253 = vmatmul.f32.vlgmr.msrb.gmra.mxu3 %v173_v6 }
  0xb3   :  { %226 = vmatmul.f32.gmra.mxu1 %v164_v56 }
  0xb4   :  { %v156_v8 = vpop.f32.mrf.mxu3 }
  0xb5   :  { %v157_v10 = vadd.f32 %v349_v36, %v156_v8 }
  0xb6   :  { %v129_v57 = vpop.f32.mrf.mxu0 }
  0xb7   :  { %v130_v59 = vadd.f32 %v349_v36, %v129_v57  ;;  %v174_v12 = vmax.f32 %v157_v10, 0.0 }
  0xb9   :  { %v165_v60 = vmax.f32 %v130_v59, 0.0  ;;  %256 = vmatmul.f32.gmra.mxu3 %v174_v12 }
  0xbb   :  { %229 = vmatmul.f32.gmra.mxu1 %v165_v60 }
  0xbe   :  { %v132_v61 = vpop.f32.mrf.mxu0 }
  0xbf   :  { %v133_v63 = vadd.f32 %v349_v36, %v132_v61 }
  0xc1   :  { %v166_v0 = vmax.f32 %v133_v63, 0.0 }
  0xc3   :  { %232 = vmatmul.f32.vlgmr.msra.gmra.mxu2 %v166_v0 }
  0xc6   :  { %v135_v1 = vpop.f32.mrf.mxu0 }
  0xc7   :  { %v136_v3 = vadd.f32 %v349_v36, %v135_v1 }
  0xc9   :  { %v167_v5 = vmax.f32 %v136_v3, 0.0 }
  0xcb   :  { %235 = vmatmul.f32.gmra.mxu2 %v167_v5 }
  0xce   :  { %v138_v7 = vpop.f32.mrf.mxu0 }
  0xcf   :  { %v139_v9 = vadd.f32 %v349_v36, %v138_v7 }
  0xd1   :  { %v168_v11 = vmax.f32 %v139_v9, 0.0 }
  0xd3   :  { %238 = vmatmul.f32.gmra.mxu2 %v168_v11 }
  0xdb   :  { %241 = vmatmul.f32.gmra.mxu2 %v169_v14 }
  0xe3   :  { %244 = vmatmul.f32.gmra.mxu2 %v170_v16 }
  0xeb   :  { %247 = vmatmul.f32.gmra.mxu2 %v171_v18 }
  0xf3   :  { %250 = vmatmul.f32.gmra.mxu2 %v172_v20 }
 0x108   :  { %v212_v22 = vpop.f32.mrf.mxu1 }
 0x109   :  { %v213_v23 = vadd.f32 %v350_v21, %v212_v22 }
 0x10b   :  { %260 = vst [vmem:[#allocation2] sm:$0xff] %v213_v23 }
 0x110   :  { %v215_v24 = vpop.f32.mrf.mxu1 }
 0x111   :  { %v216_v25 = vadd.f32 %v350_v21, %v215_v24 }
 0x113   :  { %261 = vst [vmem:[#allocation2 + $0x8] sm:$0xff] %v216_v25 }
 0x118   :  { %v218_v26 = vpop.f32.mrf.mxu1 }
 0x119   :  { %v219_v27 = vadd.f32 %v350_v21, %v218_v26 }
 0x11b   :  { %262 = vst [vmem:[#allocation2 + $0x10] sm:$0xff] %v219_v27 }
 0x120   :  { %v221_v28 = vpop.f32.mrf.mxu1 }
 0x121   :  { %v222_v29 = vadd.f32 %v350_v21, %v221_v28 }
 0x123   :  { %263 = vst [vmem:[#allocation2 + $0x18] sm:$0xff] %v222_v29 }
 0x128   :  { %v224_v30 = vpop.f32.mrf.mxu1 }
 0x129   :  { %v225_v31 = vadd.f32 %v350_v21, %v224_v30 }
 0x12b   :  { %264 = vst [vmem:[#allocation2 + $0x20] sm:$0xff] %v225_v31 }
 0x130   :  { %v227_v32 = vpop.f32.mrf.mxu1 }
 0x131   :  { %v228_v33 = vadd.f32 %v350_v21, %v227_v32 }
 0x133   :  { %265 = vst [vmem:[#allocation2 + $0x28] sm:$0xff] %v228_v33 }
 0x134   :  { %v254_v39 = vpop.f32.mrf.mxu3 }
 0x135   :  { %v255_v41 = vadd.f32 %v350_v21, %v254_v39 }
 0x137   :  { %274 = vst [vmem:[#allocation2 + $0x70] sm:$0xff] %v255_v41 }
 0x138   :  { %v230_v34 = vpop.f32.mrf.mxu1 }
 0x139   :  { %v231_v35 = vadd.f32 %v350_v21, %v230_v34 }
 0x13b   :  { %266 = vst [vmem:[#allocation2 + $0x30] sm:$0xff] %v231_v35 }
 0x13c   :  { %v257_v43 = vpop.f32.mrf.mxu3 }
 0x13d   :  { %v258_v45 = vadd.f32 %v350_v21, %v257_v43 }
 0x13f   :  { %275 = vst [vmem:[#allocation2 + $0x78] sm:$0xff] %v258_v45 }
 0x146   :  { %v233_v36 = vpop.f32.mrf.mxu2 }
 0x147   :  { %v234_v37 = vadd.f32 %v350_v21, %v233_v36 }
 0x149   :  { %267 = vst [vmem:[#allocation2 + $0x38] sm:$0xff] %v234_v37 }
 0x14e   :  { %v236_v38 = vpop.f32.mrf.mxu2 }
 0x14f   :  { %v237_v40 = vadd.f32 %v350_v21, %v236_v38 }
 0x151   :  { %268 = vst [vmem:[#allocation2 + $0x40] sm:$0xff] %v237_v40 }
 0x156   :  { %v239_v42 = vpop.f32.mrf.mxu2 }
 0x157   :  { %v240_v44 = vadd.f32 %v350_v21, %v239_v42 }
 0x159   :  { %269 = vst [vmem:[#allocation2 + $0x48] sm:$0xff] %v240_v44 }
 0x15e   :  { %v242_v46 = vpop.f32.mrf.mxu2 }
 0x15f   :  { %v243_v47 = vadd.f32 %v350_v21, %v242_v46 }
 0x161   :  { %270 = vst [vmem:[#allocation2 + $0x50] sm:$0xff] %v243_v47 }
 0x166   :  { %v245_v48 = vpop.f32.mrf.mxu2 }
 0x167   :  { %v246_v49 = vadd.f32 %v350_v21, %v245_v48 }
 0x169   :  { %271 = vst [vmem:[#allocation2 + $0x58] sm:$0xff] %v246_v49 }
 0x16e   :  { %v248_v50 = vpop.f32.mrf.mxu2 }
 0x16f   :  { %v249_v51 = vadd.f32 %v350_v21, %v248_v50 }
 0x171   :  { %272 = vst [vmem:[#allocation2 + $0x60] sm:$0xff] %v249_v51 }
 0x176   :  { %v251_v52 = vpop.f32.mrf.mxu2 }
 0x177   :  { %v252_v53 = vadd.f32 %v350_v21, %v251_v52 }
 0x179   :  { %273 = vst [vmem:[#allocation2 + $0x68] sm:$0xff] %v252_v53 }
 0x17a   :  { %288 = dma.vmem_to_hbm [thread:$0]  %s281_s13, 2048, %s283_s16, [#allocation3], %s378_s17, %s378_s17, %s379_s18  }
 0x17b   :  { %375 = dma.done.wait [#allocation3], 2048  }
 0x17c   :  { %376 = vsyncadd [#allocation3], 4294965248 }
 0x17d   :  { %293 = vsyncpa [#allocation3], 1 }

</bundles_post_ra>
